<compile_context>
chip_gen: v7x
topology: tpu7x:2x2x1
jax: 0.10.0
libtpu: 0.0.40
codegen_flags: <defaults>
</compile_context>

<pallas_src>
import functools

import jax
import jax.numpy as jnp
from jax.experimental import pallas as pl
from jax.experimental.pallas import tpu as pltpu

_LANES = 128


def _sublane_align(dtype) -> int:
    """Minimum second-minor tile multiple for a dtype (8 f32 / 16 bf16 / 32 int8)."""
    itemsize = jnp.dtype(dtype).itemsize
    return max(8, 32 // max(int(itemsize), 1))


def _focal_tile(x_raw, t_raw, alpha, gamma):
    """Per-element focal loss on one VMEM tile (computed in f32)."""
    x = x_raw.astype(jnp.float32)  # logits
    t = t_raw.astype(jnp.float32)  # targets in [0, 1]

    # Numerically stable BCE-with-logits (== F.binary_cross_entropy_with_logits):
    #   bce = max(x, 0) - x*t + log(1 + exp(-|x|))
    bce = jnp.maximum(x, 0.0) - x * t + jnp.log1p(jnp.exp(-jnp.abs(x)))

    p_t = jnp.exp(-bce)
    one_minus_pt = 1.0 - p_t

    g = float(gamma)
    if g == 0.0:
        focal_weight = jnp.ones_like(one_minus_pt)
    elif g == 1.0:
        focal_weight = one_minus_pt
    elif g == 2.0:
        focal_weight = one_minus_pt * one_minus_pt
    else:
        # general gamma > 0 via exp/log on the EUP; (1 - p_t) >= 0 always.
        focal_weight = jnp.exp(g * jnp.log(jnp.maximum(one_minus_pt, 1e-30)))

    if alpha is not None:
        a = float(alpha)
        alpha_t = a * t + (1.0 - a) * (1.0 - t)
        return alpha_t * focal_weight * bce
    return focal_weight * bce


def _focal_none_kernel(x_ref, t_ref, loss_ref, *, alpha, gamma):
    # Pure streaming: per-element loss. Padding (if any) is garbage that the
    # wrapper slices off, so no mask stream / mask math is needed here.
    loss_ref[...] = _focal_tile(x_ref[...], t_ref[...], alpha, gamma).astype(
        loss_ref.dtype)


def _focal_sum_kernel(x_ref, t_ref, psum_ref, *,
                      alpha, gamma, total, tile_rows, needs_mask):
    # Lane-wise f32 partial sums, resident across the (serial) grid.
    @pl.when(pl.program_id(0) == 0)
    def _():
        psum_ref[...] = jnp.zeros_like(psum_ref)

    loss = _focal_tile(x_ref[...], t_ref[...], alpha, gamma)

    if needs_mask:
        # Zero out tail padding using the global flat index (compile-time total).
        base = pl.program_id(0) * (tile_rows * _LANES)
        row = jax.lax.broadcasted_iota(jnp.int32, loss.shape, 0)
        lane = jax.lax.broadcasted_iota(jnp.int32, loss.shape, 1)
        flat_idx = base + row * _LANES + lane
        loss = jnp.where(flat_idx < total, loss, 0.0)

    psum_ref[...] += jnp.sum(loss, axis=0, keepdims=True)


def focal_loss(inputs, targets, alpha=1.0, gamma=2.0, reduction="mean",
               tile_rows=1024):
    """Pallas-TPU focal loss matching the PyTorch FocalLoss.forward semantics."""
    if float(gamma) < 0.0:
        raise ValueError("focal_loss requires gamma >= 0")

    orig_shape = inputs.shape
    orig_dtype = inputs.dtype
    total = int(inputs.size)

    # --- tiling: pick the big tile first, pad rows up to a multiple of it ---
    align = max(_sublane_align(inputs.dtype), _sublane_align(targets.dtype))
    rows = pl.cdiv(total, _LANES)
    tr = min(int(tile_rows), ((rows + align - 1) // align) * align)
    tr = ((tr + align - 1) // align) * align          # dtype-legal block height
    rows_p = ((rows + tr - 1) // tr) * tr             # rows padded to tile mult.
    padded = rows_p * _LANES
    num_tiles = rows_p // tr
    needs_mask = padded != total

    def _to_slab(a):
        flat = a.reshape(-1)                          # keep native dtype
        if needs_mask:
            flat = jnp.pad(flat, (0, padded - total))
        return flat.reshape(rows_p, _LANES)

    x2 = _to_slab(inputs)
    t2 = _to_slab(targets)

    in_specs = [
        pl.BlockSpec((tr, _LANES), lambda i: (i, 0)),
        pl.BlockSpec((tr, _LANES), lambda i: (i, 0)),
    ]

    if reduction in ("sum", "mean"):
        kernel = functools.partial(
            _focal_sum_kernel, alpha=alpha, gamma=gamma,
            total=total, tile_rows=tr, needs_mask=needs_mask)
        psum = pl.pallas_call(
            kernel,
            out_shape=jax.ShapeDtypeStruct((1, _LANES), jnp.float32),
            grid_spec=pltpu.PrefetchScalarGridSpec(
                num_scalar_prefetch=0,
                grid=(num_tiles,),
                in_specs=in_specs,
                out_specs=pl.BlockSpec((1, _LANES), lambda i: (0, 0)),
            ),
            compiler_params=pltpu.CompilerParams(
                dimension_semantics=("arbitrary",)),   # resident accumulator
        )(x2, t2)
        total_sum = jnp.sum(psum)
        if reduction == "mean":
            return total_sum / jnp.float32(total)
        return total_sum

    # reduction == 'none'
    kernel = functools.partial(_focal_none_kernel, alpha=alpha, gamma=gamma)
    loss_pad = pl.pallas_call(
        kernel,
        out_shape=jax.ShapeDtypeStruct((rows_p, _LANES), orig_dtype),
        grid_spec=pltpu.PrefetchScalarGridSpec(
            num_scalar_prefetch=0,
            grid=(num_tiles,),
            in_specs=in_specs,
            out_specs=pl.BlockSpec((tr, _LANES), lambda i: (i, 0)),
        ),
        compiler_params=pltpu.CompilerParams(
            dimension_semantics=("parallel",)),
    )(x2, t2)
    return loss_pad.reshape(-1)[:total].reshape(orig_shape)


def _focal_loss_ref(inputs, targets, alpha=1.0, gamma=2.0, reduction="mean"):
    """Pure-JAX reference mirroring the PyTorch module."""
    x = inputs.astype(jnp.float32)
    t = targets.astype(jnp.float32)
    bce = jnp.maximum(x, 0.0) - x * t + jnp.log1p(jnp.exp(-jnp.abs(x)))
    p_t = jnp.exp(-bce)
    fw = (1.0 - p_t) ** gamma
    if alpha is not None:
        a_t = alpha * t + (1.0 - alpha) * (1.0 - t)
        loss = a_t * fw * bce
    else:
        loss = fw * bce
    if reduction == "mean":
        return loss.mean()
    elif reduction == "sum":
        return loss.sum()
    return loss


if __name__ == "__main__":
    key = jax.random.PRNGKey(0)
    k1, k2, k3, k4 = jax.random.split(key, 4)

    # --- main test: NCHW logits + soft binary targets (as the module expects) ---
    x = jax.random.normal(k1, (2, 4, 16, 16), dtype=jnp.float32) * 2.0
    t = jax.random.uniform(k2, (2, 4, 16, 16), dtype=jnp.float32)

    out_mean = jax.block_until_ready(focal_loss(x, t, 1.0, 2.0, "mean"))
    out_sum = jax.block_until_ready(focal_loss(x, t, 1.0, 2.0, "sum"))
    out_none = jax.block_until_ready(focal_loss(x, t, 1.0, 2.0, "none"))

    assert jnp.allclose(out_mean, _focal_loss_ref(x, t, 1.0, 2.0, "mean"),
                        rtol=1e-5, atol=1e-5)
    assert jnp.allclose(out_sum, _focal_loss_ref(x, t, 1.0, 2.0, "sum"),
                        rtol=1e-4, atol=1e-4)
    assert jnp.allclose(out_none, _focal_loss_ref(x, t, 1.0, 2.0, "none"),
                        rtol=1e-5, atol=1e-5)
    assert out_none.shape == x.shape

    # --- awkward size: exercises padding + in-kernel tail mask + multi-tile ---
    xa = jax.random.normal(k3, (3, 5, 17, 13), dtype=jnp.float32)
    ta = jax.random.uniform(k4, (3, 5, 17, 13), dtype=jnp.float32)
    out_a_sum = jax.block_until_ready(
        focal_loss(xa, ta, 0.25, 2.0, "sum", tile_rows=8))
    out_a_none = jax.block_until_ready(
        focal_loss(xa, ta, 0.25, 2.0, "none", tile_rows=8))
    assert jnp.allclose(out_a_sum, _focal_loss_ref(xa, ta, 0.25, 2.0, "sum"),
                        rtol=1e-4, atol=1e-4)
    assert jnp.allclose(out_a_none, _focal_loss_ref(xa, ta, 0.25, 2.0, "none"),
                        rtol=1e-5, atol=1e-5)

    # --- native bf16 inputs stay bf16 through the BlockSpec (cast in-kernel) ---
    xb = xa.astype(jnp.bfloat16)
    out_b_mean = jax.block_until_ready(
        focal_loss(xb, ta, 1.0, 2.0, "mean", tile_rows=16))
    assert jnp.allclose(out_b_mean, _focal_loss_ref(xb, ta, 1.0, 2.0, "mean"),
                        rtol=2e-2, atol=2e-2)

    print("KERNEL_OK")
</pallas_src>

<mosaic_0001>
module attributes {stable_mosaic.version = 11 : i64} {
  func.func @_focal_sum_kernel(%arg0: i32, %arg1: memref<16x128xf32, #tpu.memory_space<vmem>>, %arg2: memref<16x128xf32, #tpu.memory_space<vmem>>, %arg3: memref<1x128xf32, #tpu.memory_space<vmem>>) attributes {dimension_semantics = [#tpu.dimension_semantics<arbitrary>], iteration_bounds = array<i64: 1>, scalar_prefetch = 0 : i64, scratch_operands = 0 : i64, tpu.core_type = #tpu.core_type<tc>, window_params = [{transform_indices = @transform_0, window_bounds = array<i64: 16, 128>}, {transform_indices = @transform_1, window_bounds = array<i64: 16, 128>}, {pipeline_mode = #tpu.pipeline_mode<synchronous>, transform_indices = @transform_2, window_bounds = array<i64: 1, 128>}]} {
    %c0_i32 = arith.constant 0 : i32
    %0 = arith.cmpi eq, %arg0, %c0_i32 : i32
    %1 = arith.extui %0 : i1 to i32
    %c0_i32_0 = arith.constant 0 : i32
    %2 = arith.cmpi ne, %1, %c0_i32_0 : i32
    scf.if %2 {
      %cst_15 = arith.constant 0.000000e+00 : f32
      %35 = vector.broadcast %cst_15 : f32 to vector<1x128xf32>
      %c0_16 = arith.constant 0 : index
      %c0_17 = arith.constant 0 : index
      %36 = vector.load %arg3[%c0_16, %c0_17] : memref<1x128xf32, #tpu.memory_space<vmem>>, vector<1x128xf32>
      tpu.vector_store %arg3[%c0_16, %c0_17], %35 {strides = array<i32>} : memref<1x128xf32, #tpu.memory_space<vmem>>, vector<1x128xf32>,
    } else {
    }
    %c0 = arith.constant 0 : index
    %c0_1 = arith.constant 0 : index
    %3 = vector.load %arg1[%c0, %c0_1] : memref<16x128xf32, #tpu.memory_space<vmem>>, vector<16x128xf32>
    %c0_2 = arith.constant 0 : index
    %c0_3 = arith.constant 0 : index
    %4 = vector.load %arg2[%c0_2, %c0_3] : memref<16x128xf32, #tpu.memory_space<vmem>>, vector<16x128xf32>
    %cst = arith.constant 0.000000e+00 : f32
    %5 = vector.broadcast %cst : f32 to vector<16x128xf32>
    %6 = arith.maximumf %3, %5 : vector<16x128xf32>
    %7 = arith.mulf %3, %4 : vector<16x128xf32>
    %8 = arith.subf %6, %7 : vector<16x128xf32>
    %9 = math.absf %3 : vector<16x128xf32>
    %cst_4 = arith.constant 0.000000e+00 : f32
    %10 = vector.broadcast %cst_4 : f32 to vector<16x128xf32>
    %11 = arith.subf %10, %9 : vector<16x128xf32>
    %12 = math.exp %11 : vector<16x128xf32>
    %13 = math.log1p %12 : vector<16x128xf32>
    %14 = arith.addf %8, %13 : vector<16x128xf32>
    %cst_5 = arith.constant 0.000000e+00 : f32
    %15 = vector.broadcast %cst_5 : f32 to vector<16x128xf32>
    %16 = arith.subf %15, %14 : vector<16x128xf32>
    %17 = math.exp %16 : vector<16x128xf32>
    %cst_6 = arith.constant 1.000000e+00 : f32
    %18 = vector.broadcast %cst_6 : f32 to vector<16x128xf32>
    %19 = arith.subf %18, %17 : vector<16x128xf32>
    %20 = arith.mulf %19, %19 : vector<16x128xf32>
    %cst_7 = arith.constant 1.000000e+00 : f32
    %21 = vector.broadcast %cst_7 : f32 to vector<16x128xf32>
    %22 = arith.mulf %21, %4 : vector<16x128xf32>
    %cst_8 = arith.constant 1.000000e+00 : f32
    %23 = vector.broadcast %cst_8 : f32 to vector<16x128xf32>
    %24 = arith.subf %23, %4 : vector<16x128xf32>
    %cst_9 = arith.constant 0.000000e+00 : f32
    %25 = vector.broadcast %cst_9 : f32 to vector<16x128xf32>
    %26 = arith.mulf %25, %24 : vector<16x128xf32>
    %27 = arith.addf %22, %26 : vector<16x128xf32>
    %28 = arith.mulf %27, %20 : vector<16x128xf32>
    %29 = arith.mulf %28, %14 : vector<16x128xf32>
    %c0_10 = arith.constant 0 : index
    %c0_11 = arith.constant 0 : index
    %30 = vector.load %arg3[%c0_10, %c0_11] : memref<1x128xf32, #tpu.memory_space<vmem>>, vector<1x128xf32>
    %cst_12 = arith.constant dense<0.000000e+00> : vector<128xf32>
    %31 = vector.multi_reduction <add>, %29, %cst_12 [0] : vector<16x128xf32> to vector<128xf32>
    %32 = vector.shape_cast %31 : vector<128xf32> to vector<1x128xf32>
    %33 = arith.addf %30, %32 : vector<1x128xf32>
    %c0_13 = arith.constant 0 : index
    %c0_14 = arith.constant 0 : index
    %34 = vector.load %arg3[%c0_13, %c0_14] : memref<1x128xf32, #tpu.memory_space<vmem>>, vector<1x128xf32>
    tpu.vector_store %arg3[%c0_13, %c0_14], %33 {strides = array<i32>} : memref<1x128xf32, #tpu.memory_space<vmem>>, vector<1x128xf32>,
    return
  }
  func.func @transform_0(%arg0: i32) -> (i32, i32) {
    %c0_i32 = arith.constant 0 : i32
    %c0_i32_0 = arith.constant 0 : i32
    return %arg0, %c0_i32 : i32, i32
  }
  func.func @transform_1(%arg0: i32) -> (i32, i32) {
    %c0_i32 = arith.constant 0 : i32
    %c0_i32_0 = arith.constant 0 : i32
    return %arg0, %c0_i32 : i32, i32
  }
  func.func @transform_2(%arg0: i32) -> (i32, i32) {
    %c0_i32 = arith.constant 0 : i32
    %c0_i32_0 = arith.constant 0 : i32
    %c0_i32_1 = arith.constant 0 : i32
    return %c0_i32, %c0_i32_0 : i32, i32
  }
}

</mosaic_0001>

<bundles_post_ra>
// kernel: tpu_custom_call.1
= control target key start
LH: loop header
LB: loop body
LE: loop exit
PB: predicated region body
PF: predicated region fallthrough
CT: control target
= control target key end

     0   :  { %7 = vsyncpa [#allocation3], 0  ;;  %s276_s0 = inlined_call_operand.hbm [shape: f32[16,128], index: 0, kind: input, shape index: {}]   ;;  %s277_s1 = inlined_call_operand.hbm [shape: f32[16,128], index: 1, kind: input, shape index: {}]   ;;  %s278_s2 = inlined_call_operand.hbm [shape: f32[1,128], index: 2, kind: output, shape index: {}]  }
   0x1   :  { %8 = vsyncpa [#allocation6], 0 }
   0x2   :  { %9 = vsyncpa [#allocation4], 0  ;;  %s219_s9 = smov [#allocation2]   ;;  %s147_s13 = scalar_lea.hbm %s276_s0, 256 }
   0x3   :  { %s15_s10 = sshll.u32 %s219_s9, 4  ;;  %p148_p0 = scmp.ne.s32.totalorder %s276_s0, %s147_s13  ;;  %s16_s10 = int_to_ptr.vmem [resolvable:$true] %s15_s10 }
   0x4   :  { %p151_p1 = scmp.lt.u32.totalorder %s147_s13, %s276_s0 }
   0x6   :  { %p153_p2 = pnand %p151_p1, %p148_p0 }
   0x8   :  { %156 = shalt.err (!%p153_p2)
}
   0x9   :  { %s157_s18 = scalar_lea.vmem %s16_s10, 256  ;;  %p162_p4 = scmp.lt.s32.totalorder %s16_s10, %s16_s10 }
   0xa   :  { %p158_p3 = scmp.ne.s32.totalorder %s16_s10, %s157_s18  ;;  %p163_p5 = scmp.lt.s32.totalorder %s157_s18, %s157_s18 }
   0xc   :  { %p164_p6 = por %p163_p5, %p162_p4 }
   0xe   :  { %p165_p7 = pnand %p164_p6, %p158_p3 }
  0x10   :  { %168 = shalt.err (!%p165_p7)
}
  0x11   :  { %s220_s19 = smov 128   ;;  %s221_s20 = smov 8  }
  0x12   :  { %21 = dma.hbm_to_vmem [thread:$0]  %s276_s0, 256, %s16_s10, [#allocation3], %s220_s19, %s220_s19, %s221_s20  }
  0x13   :  { %s222_s23 = smov [#allocation5]   ;;  %s169_s27 = scalar_lea.hbm %s277_s1, 256 }
  0x14   :  { %s27_s24 = sshll.u32 %s222_s23, 4  ;;  %p170_p8 = scmp.ne.s32.totalorder %s277_s1, %s169_s27  ;;  %s28_s24 = int_to_ptr.vmem [resolvable:$true] %s27_s24 }
  0x15   :  { %p173_p9 = scmp.lt.u32.totalorder %s169_s27, %s277_s1 }
  0x17   :  { %p175_p10 = pnand %p173_p9, %p170_p8 }
  0x19   :  { %178 = shalt.err (!%p175_p10)
}
  0x1a   :  { %s179_s4 = scalar_lea.vmem %s28_s24, 256  ;;  %p184_p12 = scmp.lt.s32.totalorder %s28_s24, %s28_s24 }
  0x1b   :  { %p180_p11 = scmp.ne.s32.totalorder %s28_s24, %s179_s4  ;;  %p185_p13 = scmp.lt.s32.totalorder %s179_s4, %s179_s4 }
  0x1d   :  { %p186_p0 = por %p185_p13, %p184_p12 }
  0x1f   :  { %p187_p1 = pnand %p186_p0, %p180_p11 }
  0x21   :  { %190 = shalt.err (!%p187_p1)
}
  0x22   :  { %33 = dma.hbm_to_vmem [thread:$0]  %s277_s1, 256, %s28_s24, [#allocation6], %s220_s19, %s220_s19, %s221_s20  }
  0x23   :  { %213 = dma.done.wait [#allocation3], 256  }
  0x24   :  { %214 = vsyncadd [#allocation3], 4294967040 }
  0x25   :  { %215 = dma.done.wait [#allocation6], 256  }
  0x26   :  { %216 = vsyncadd [#allocation6], 4294967040  ;;  %v223_v0 = vmov 0.0   ;;  %v45_v1 = vld [vmem:[#allocation2] sm:$0xff]  ;;  %v46_v2 = vld [vmem:[#allocation2 + $0x8] sm:$0xff]  ;;  %s224_s1 = smov [#allocation7]  }
  0x27   :  { %44 = vst [vmem:[#allocation7] sm:$0x1] %v223_v0  ;;  %v55_v3 = vand.u32 2147483647, %v45_v1  ;;  %v56_v4 = vand.u32 2147483647, %v46_v2 }
  0x28   :  { %v47_v15 = vld [vmem:[#allocation5] sm:$0xff]  ;;  %v48_v16 = vld [vmem:[#allocation5 + $0x8] sm:$0xff]  ;;  %v49_v18 = vmax.f32 %v45_v1, 0.0  ;;  %v50_v22 = vmax.f32 %v46_v2, 0.0  ;;  %s119_s6 = sshll.u32 %s224_s1, 4  ;;  %s120_s6 = int_to_ptr.vmem [resolvable:$true] %s119_s6 }
  0x29   :  { %v57_v5 = vsub.f32 0.0, %v55_v3  ;;  %v58_v6 = vsub.f32 0.0, %v56_v4  ;;  %v51_v19 = vmul.f32 %v47_v15, %v45_v1  ;;  %v52_v23 = vmul.f32 %v48_v16, %v46_v2  ;;  %s191_s7 = scalar_lea.vmem %s120_s6, 16  ;;  %s195_s8 = scalar_lea.vmem %s120_s6, 32 }
  0x2a   :  { %v93_v41 = vsub.f32 1.0, %v47_v15  ;;  %v94_v42 = vsub.f32 1.0, %v48_v16  ;;  %p192_p2 = scmp.ne.s32.totalorder %s120_s6, %s191_s7  ;;  %p196_p3 = scmp.lt.s32.totalorder %s120_s6, %s120_s6 }
  0x2b   :  { %v59_v7 = vmul.f32 1.442695, %v57_v5  ;;  %v61_v8 = vmul.f32 1.442695, %v58_v6  ;;  %v53_v27 = vsub.f32 %v49_v18, %v51_v19  ;;  %v54_v30 = vsub.f32 %v50_v22, %v52_v23  ;;  %p197_p4 = scmp.lt.s32.totalorder %s195_s8, %s191_s7 }
  0x2c   :  { %v95_v43 = vmul.f32 0.0, %v93_v41  ;;  %v96_v44 = vmul.f32 0.0, %v94_v42 }
  0x2d   :  { %135 = vpow2.f32 %v59_v7  ;;  %p198_p5 = por %p197_p4, %p196_p3 }
  0x2e   :  { %137 = vpow2.f32 %v61_v8  ;;  %v97_v48 = vadd.f32 %v95_v43, %v47_v15  ;;  %v98_v50 = vadd.f32 %v96_v44, %v48_v16  ;;  %v103_v63 = vld [vmem:[#allocation7] sm:$0x1] }
  0x2f   :  { %p199_p6 = pnand %p198_p5, %p192_p2 }
  0x37   :  { %v136_v9 = vpop.eup %135 }
  0x38   :  { %v138_v10 = vpop.eup %137  ;;  %v63_v11 = vadd.f32 1.0, %v136_v9  ;;  %v66_v13 = vmul.f32 -0.5, %v136_v9  ;;  %v69_v20 = vand.u32 2147483647, %v136_v9 }
  0x39   :  { %v72_v12 = vadd.f32 1.0, %v138_v10  ;;  %v75_v14 = vmul.f32 -0.5, %v138_v10  ;;  %v78_v24 = vand.u32 2147483647, %v138_v10 }
  0x3a   :  { %139 = vlog2.f32 %v63_v11  ;;  %v67_v17 = vadd.f32 1.0, %v66_v13  ;;  %vm70_vm0 = vcmp.lt.f32.partialorder %v69_v20, 0.0004427343 }
  0x3b   :  { %141 = vlog2.f32 %v72_v12  ;;  %v76_v21 = vadd.f32 1.0, %v75_v14  ;;  %vm79_vm1 = vcmp.lt.f32.partialorder %v78_v24, 0.0004427343 }
  0x3c   :  { %v68_v25 = vmul.f32 %v136_v9, %v67_v17 }
  0x3d   :  { %v77_v28 = vmul.f32 %v138_v10, %v76_v21 }
  0x44   :  { %v140_v26 = vpop.eup %139 }
  0x45   :  { %v142_v29 = vpop.eup %141  ;;  %v65_v31 = vmul.f32 0.6931472, %v140_v26 }
  0x46   :  { %v74_v32 = vmul.f32 0.6931472, %v142_v29 }
  0x47   :  { %v71_v33 = vsel %vm70_vm0, %v68_v25, %v65_v31 }
  0x48   :  { %v80_v34 = vsel %vm79_vm1, %v77_v28, %v74_v32  ;;  %v81_v35 = vadd.f32 %v71_v33, %v53_v27 }
  0x49   :  { %v82_v36 = vadd.f32 %v80_v34, %v54_v30 }
  0x4a   :  { %v83_v37 = vsub.f32 0.0, %v81_v35 }
  0x4b   :  { %v84_v38 = vsub.f32 0.0, %v82_v36 }
  0x4c   :  { %v85_v39 = vmul.f32 1.442695, %v83_v37 }
  0x4d   :  { %v87_v40 = vmul.f32 1.442695, %v84_v38 }
  0x4e   :  { %143 = vpow2.f32 %v85_v39 }
  0x4f   :  { %145 = vpow2.f32 %v87_v40 }
  0x58   :  { %v144_v45 = vpop.eup %143 }
  0x59   :  { %v146_v46 = vpop.eup %145  ;;  %v89_v47 = vsub.f32 1.0, %v144_v45 }
  0x5a   :  { %v90_v49 = vsub.f32 1.0, %v146_v46 }
  0x5b   :  { %v91_v51 = vmul.f32 %v89_v47, %v89_v47 }
  0x5c   :  { %v92_v52 = vmul.f32 %v90_v49, %v90_v49 }
  0x5d   :  { %v99_v53 = vmul.f32 %v97_v48, %v91_v51 }
  0x5e   :  { %v100_v54 = vmul.f32 %v98_v50, %v92_v52 }
  0x5f   :  { %v101_v55 = vmul.f32 %v99_v53, %v81_v35 }
  0x60   :  { %v102_v56 = vmul.f32 %v100_v54, %v82_v36 }
  0x62   :  { %v104_v57 = vadd.f32 %v102_v56, %v101_v55 }
  0x64   :  { %v105_v58 = vrot.slane %v104_v57, 4 }
  0x66   :  { %v106_v59 = vadd.f32 %v105_v58, %v104_v57 }
  0x68   :  { %v107_v60 = vrot.slane %v106_v59, 2 }
  0x6a   :  { %v108_v61 = vadd.f32 %v107_v60, %v106_v59 }
  0x6c   :  { %v109_v62 = vrot.slane %v108_v61, 1 }
  0x6e   :  { %v110_v0 = vadd.f32 %v109_v62, %v108_v61 }
  0x70   :  { %v111_v1 = vadd.f32 %v110_v0, %v103_v63 }
  0x72   :  { %112 = vst [vmem:[#allocation7] sm:$0x1] %v111_v1 }
  0x73   :  { %202 = shalt.err (!%p199_p6)
}
  0x74   :  { %s203_s11 = scalar_lea.hbm %s278_s2, 16 }
  0x75   :  { %p204_p7 = scmp.ne.s32.totalorder %s278_s2, %s203_s11  ;;  %p207_p8 = scmp.lt.u32.totalorder %s203_s11, %s278_s2 }
  0x77   :  { %p209_p9 = pnand %p207_p8, %p204_p7 }
  0x79   :  { %212 = shalt.err (!%p209_p9)
}
  0x7a   :  { %122 = dma.vmem_to_hbm [thread:$0]  %s120_s6, 16, %s278_s2, [#allocation4]  }
  0x7b   :  { %217 = dma.done.wait [#allocation4], 16  }
  0x7c   :  { %218 = vsyncadd [#allocation4], 4294967280 }
  0x7d   :  { %126 = vsyncpa [#allocation3], 1 }
  0x7e   :  { %127 = vsyncpa [#allocation6], 1 }
  0x7f   :  { %128 = vsyncpa [#allocation4], 1 }

</bundles_post_ra>
